<compile_context>
chip_gen: v7x
topology: tpu7x:2x2x1
jax: 0.10.0
libtpu: 0.0.40
codegen_flags: <defaults>
</compile_context>

<pallas_src>
import jax
import jax.numpy as jnp
from jax import lax
from jax.experimental import pallas as pl
from jax.experimental.pallas import tpu as pltpu


def _round_up(x, m):
    return ((x + m - 1) // m) * m


def _gemm_bias_kernel(w_ref, col_ref, b_ref, o_ref):
    """One (batch, spatial-tile) output block per grid step.

    w_ref   : (Cout, Kp)   bf16  reshaped + zero-padded conv weights (resident)
    col_ref : (Kp, Tn)     bf16  im2col patch tile (spatial on lanes)
    b_ref   : (Cout, 1)    f32   bias column (resident)
    o_ref   : (Cout, Tn)   out_dtype
    """
    acc = jnp.dot(w_ref[...], col_ref[...],
                  preferred_element_type=jnp.float32)      # MXU, f32 accumulate
    o_ref[...] = (acc + b_ref[...]).astype(o_ref.dtype)    # bias epilogue, final dtype


def _im2col(x_pad, kernel_size, stride, dilation, out_hw, k_extra):
    """(B, Cin, Hp, Wp) -> (B, Kh*Kw*Cin + k_extra, Ho*Wo); K ordered (kh, kw, cin).

    One concatenate = one HBM write of the patch matrix, already bf16 and
    already zero-padded on K (the strided taps are fused slices of x_pad).
    """
    b, cin, _, _ = x_pad.shape
    kh, kw = kernel_size
    sh, sw = stride
    dh, dw = dilation
    ho, wo = out_hw
    taps = []
    for i in range(kh):
        for j in range(kw):
            h0, w0 = i * dh, j * dw
            taps.append(lax.slice(
                x_pad,
                (0, 0, h0, w0),
                (b, cin, h0 + (ho - 1) * sh + 1, w0 + (wo - 1) * sw + 1),
                (1, 1, sh, sw)))                       # (B, Cin, Ho, Wo)
    if k_extra:
        taps.append(jnp.zeros((b, k_extra, ho, wo), x_pad.dtype))
    cols = jnp.concatenate(taps, axis=1)               # (B, Kp, Ho, Wo)
    return cols.reshape(b, cols.shape[1], ho * wo)     # metadata-only reshape


def conv2d_pallas(x, weights, bias, *, stride, padding, dilation,
                  tile_n=1024, out_dtype=None):
    """x: (B, Cin, H, W) NCHW -> (B, Cout, Ho, Wo)."""
    b, cin, h, w = x.shape
    cout, cin_w, kh, kw = weights.shape
    assert cin == cin_w
    sh, sw = stride
    ph, pw = padding
    dh, dw = dilation
    out_dtype = x.dtype if out_dtype is None else out_dtype
    out_elem = jnp.dtype(out_dtype).itemsize

    dil_kh = 1 + dh * (kh - 1)
    dil_kw = 1 + dw * (kw - 1)
    hp, wp = h + 2 * ph, w + 2 * pw
    assert hp >= dil_kh and wp >= dil_kw, "dilated kernel larger than padded input"
    ho = (hp - dil_kh) // sh + 1          # integer arithmetic (no float floor)
    wo = (wp - dil_kw) // sw + 1
    n = ho * wo

    kdim = cin * kh * kw
    k_pad = _round_up(kdim, 16)           # bf16 sublane packing multiple

    # Spatial tile: multiple of 128 lanes (unmasked stores). If a single tile
    # covers the whole spatial axis, use the exact size (full-dim blocks are
    # exempt from the 128-lane rule and need no edge masking at all).
    tile_n = max(128, _round_up(min(tile_n, n), 128))
    if tile_n >= n:
        tile_n = n

    # Keep the per-step working set (resident W + bias, double-buffered cols
    # blocks, double-buffered output blocks) under ~40 MiB so pipelining
    # survives v7x's 64 MiB VMEM; v5e/v6e (128 MiB) are then trivially fine.
    def ws_bytes(tn):
        return (cout * k_pad * 2 + cout * 4
                + 2 * k_pad * tn * 2
                + 2 * cout * tn * out_elem)

    while tile_n > 128 and ws_bytes(tile_n) > 40 * 2**20:
        tile_n = _round_up(tile_n // 2, 128)
    n_tiles = pl.cdiv(n, tile_n)

    # ---- layout glue (plain JAX, minimized HBM passes) ----
    # bf16 BEFORE the Kh*Kw expansion: half-width patch matrix write + read.
    x_pad = jnp.pad(x.astype(jnp.bfloat16),
                    ((0, 0), (0, 0), (ph, ph), (pw, pw)))
    cols = _im2col(x_pad, (kh, kw), (sh, sw), (dh, dw), (ho, wo), k_pad - kdim)
    # Weights to (Cout, Kh*Kw*Cin) matching the cols K ordering, zero-padded K.
    w2d = weights.transpose(0, 2, 3, 1).reshape(cout, kdim)
    w2d = jnp.pad(w2d, ((0, 0), (0, k_pad - kdim))).astype(jnp.bfloat16)
    bias_col = bias.reshape(cout, 1).astype(jnp.float32)

    cost = pl.CostEstimate(
        flops=2 * b * cout * k_pad * n,
        transcendentals=0,
        bytes_accessed=int(cols.size * 2 + w2d.size * 2 + bias_col.size * 4
                           + b * cout * n * out_elem))

    vmem_limit = int(min(64 * 2**20, max(32 * 2**20, 2 * ws_bytes(tile_n))))

    # NOTE: if the cols DMA is still exposed after the tile_n sweep, add
    # pipeline_mode=pl.Buffered(3) on the cols BlockSpec (VMEM headroom permitting).
    out = pl.pallas_call(
        _gemm_bias_kernel,
        out_shape=jax.ShapeDtypeStruct((b, cout, n), out_dtype),
        grid_spec=pltpu.PrefetchScalarGridSpec(
            num_scalar_prefetch=0,
            grid=(b, n_tiles),
            in_specs=[
                pl.BlockSpec((cout, k_pad), lambda bi, ni: (0, 0)),
                # None = squeezed size-1 batch dim (kernel sees (Kp, Tn)).
                pl.BlockSpec((None, k_pad, tile_n), lambda bi, ni: (bi, 0, ni)),
                pl.BlockSpec((cout, 1), lambda bi, ni: (0, 0)),
            ],
            out_specs=pl.BlockSpec((None, cout, tile_n),
                                   lambda bi, ni: (bi, 0, ni)),
        ),
        compiler_params=pltpu.CompilerParams(
            dimension_semantics=("parallel", "parallel"),
            vmem_limit_bytes=vmem_limit,
        ),
        cost_estimate=cost,
    )(w2d, cols, bias_col)

    # Spatial axis is exact (no lane padding), so this reshape is free.
    return out.reshape(b, cout, ho, wo)


def _conv_ref(x, w, b_, stride, padding, dilation):
    """lax reference on the same bf16-rounded inputs (f32 accumulation)."""
    xq = x.astype(jnp.bfloat16).astype(jnp.float32)
    wq = w.astype(jnp.bfloat16).astype(jnp.float32)
    out = lax.conv_general_dilated(
        xq, wq,
        window_strides=stride,
        padding=[(padding[0], padding[0]), (padding[1], padding[1])],
        rhs_dilation=dilation,
        dimension_numbers=("NCHW", "OIHW", "NCHW"),
        precision=lax.Precision.HIGHEST)
    return out + b_[None, :, None, None]


if __name__ == "__main__":
    key = jax.random.PRNGKey(0)
    kx, kw_, kb = jax.random.split(key, 3)

    batch, in_channels, out_channels = 2, 4, 8
    hw = 16
    x = jax.random.normal(kx, (batch, in_channels, hw, hw), dtype=jnp.float32)
    # Deterministic parameter init mirroring init_weights(): randn weights.
    weights = jax.random.normal(
        kw_, (out_channels, in_channels, 3, 3), dtype=jnp.float32)

    # Config 1: module defaults (zero bias), stride/pad/dilation = 1/1/1.
    bias0 = jnp.zeros((out_channels,), dtype=jnp.float32)
    out1 = conv2d_pallas(x, weights, bias0,
                         stride=(1, 1), padding=(1, 1), dilation=(1, 1))
    out1 = jax.block_until_ready(out1)
    ref1 = _conv_ref(x, weights, bias0, (1, 1), (1, 1), (1, 1))
    assert out1.shape == (batch, out_channels, hw, hw), out1.shape
    assert jnp.allclose(out1, ref1, atol=1e-3, rtol=1e-3), "mismatch (config 1)"

    # Config 2: nonzero bias + stride 2 + dilation 2 to exercise the general
    # (bias add, strided/dilated patch, partial-lane tile) paths.
    bias1 = jax.random.normal(kb, (out_channels,), dtype=jnp.float32)
    out2 = conv2d_pallas(x, weights, bias1,
                         stride=(2, 2), padding=(2, 2), dilation=(2, 2))
    out2 = jax.block_until_ready(out2)
    ref2 = _conv_ref(x, weights, bias1, (2, 2), (2, 2), (2, 2))
    assert out2.shape == ref2.shape, (out2.shape, ref2.shape)
    assert jnp.allclose(out2, ref2, atol=1e-3, rtol=1e-3), "mismatch (config 2)"

    print("KERNEL_OK")
</pallas_src>

<mosaic_0001>
module attributes {stable_mosaic.version = 11 : i64} {
  func.func @_gemm_bias_kernel(%arg0: i32, %arg1: i32, %arg2: memref<8x48xbf16, #tpu.memory_space<vmem>>, %arg3: memref<1x48x256xbf16, #tpu.memory_space<vmem>>, %arg4: memref<8x1xf32, #tpu.memory_space<vmem>>, %arg5: memref<1x8x256xf32, #tpu.memory_space<vmem>>) attributes {dimension_semantics = [#tpu.dimension_semantics<parallel>, #tpu.dimension_semantics<parallel>], iteration_bounds = array<i64: 2, 1>, scalar_prefetch = 0 : i64, scratch_operands = 0 : i64, tpu.core_type = #tpu.core_type<tc>, window_params = [{pipeline_mode = #tpu.pipeline_mode<synchronous>, transform_indices = @transform_0, window_bounds = array<i64: 8, 48>}, {transform_indices = @transform_1, window_bounds = array<i64: 1, 48, 256>}, {pipeline_mode = #tpu.pipeline_mode<synchronous>, transform_indices = @transform_2, window_bounds = array<i64: 8, 1>}, {transform_indices = @transform_3, window_bounds = array<i64: 1, 8, 256>}]} {
    %c0 = arith.constant 0 : index
    %c0_0 = arith.constant 0 : index
    %0 = vector.load %arg2[%c0, %c0_0] : memref<8x48xbf16, #tpu.memory_space<vmem>>, vector<8x48xbf16>
    %c0_1 = arith.constant 0 : index
    %c0_2 = arith.constant 0 : index
    %c0_3 = arith.constant 0 : index
    %1 = vector.load %arg3[%c0_1, %c0_2, %c0_3] : memref<1x48x256xbf16, #tpu.memory_space<vmem>>, vector<1x48x256xbf16>
    %2 = vector.shape_cast %1 : vector<1x48x256xbf16> to vector<48x256xbf16>
    %cst = arith.constant dense<0.000000e+00> : vector<8x256xf32>
    %3 = tpu.matmul %0, %2, %cst {dimension_numbers = #tpu.dot_dimension_numbers<[1], [0], [0], [1], [0, 0, 1, 1], [], []>} : vector<8x48xbf16>, vector<48x256xbf16>, vector<8x256xf32> -> vector<8x256xf32>
    %c0_4 = arith.constant 0 : index
    %c0_5 = arith.constant 0 : index
    %4 = vector.load %arg4[%c0_4, %c0_5] : memref<8x1xf32, #tpu.memory_space<vmem>>, vector<8x1xf32>
    %5 = vector.broadcast %4 : vector<8x1xf32> to vector<8x256xf32>
    %6 = arith.addf %3, %5 : vector<8x256xf32>
    %c0_6 = arith.constant 0 : index
    %c0_7 = arith.constant 0 : index
    %c0_8 = arith.constant 0 : index
    %7 = vector.load %arg5[%c0_6, %c0_7, %c0_8] : memref<1x8x256xf32, #tpu.memory_space<vmem>>, vector<1x8x256xf32>
    %8 = vector.shape_cast %7 : vector<1x8x256xf32> to vector<8x256xf32>
    %9 = vector.shape_cast %6 : vector<8x256xf32> to vector<1x8x256xf32>
    tpu.vector_store %arg5[%c0_6, %c0_7, %c0_8], %9 {strides = array<i32>} : memref<1x8x256xf32, #tpu.memory_space<vmem>>, vector<1x8x256xf32>,
    return
  }
  func.func @transform_0(%arg0: i32, %arg1: i32) -> (i32, i32) {
    %c0_i32 = arith.constant 0 : i32
    %c0_i32_0 = arith.constant 0 : i32
    %c0_i32_1 = arith.constant 0 : i32
    return %c0_i32, %c0_i32_0 : i32, i32
  }
  func.func @transform_1(%arg0: i32, %arg1: i32) -> (i32, i32, i32) {
    %c0_i32 = arith.constant 0 : i32
    %c0_i32_0 = arith.constant 0 : i32
    return %arg0, %c0_i32, %arg1 : i32, i32, i32
  }
  func.func @transform_2(%arg0: i32, %arg1: i32) -> (i32, i32) {
    %c0_i32 = arith.constant 0 : i32
    %c0_i32_0 = arith.constant 0 : i32
    %c0_i32_1 = arith.constant 0 : i32
    return %c0_i32, %c0_i32_0 : i32, i32
  }
  func.func @transform_3(%arg0: i32, %arg1: i32) -> (i32, i32, i32) {
    %c0_i32 = arith.constant 0 : i32
    %c0_i32_0 = arith.constant 0 : i32
    return %arg0, %c0_i32, %arg1 : i32, i32, i32
  }
}

</mosaic_0001>

<bundles_post_ra>
// kernel: tpu_custom_call.1
= control target key start
LH: loop header
LB: loop body
LE: loop exit
PB: predicated region body
PF: predicated region fallthrough
CT: control target
= control target key end

     0   :  { %8 = vsyncpa [#allocation3], 0  ;;  %s818_s0 = inlined_call_operand.vmem [shape: bf16[8,48], index: 0, kind: input, shape index: {}]   ;;  %s819_s1 = inlined_call_operand.hbm [shape: bf16[2,48,256], index: 1, kind: input, shape index: {}]   ;;  %s820_s2 = inlined_call_operand.vmem [shape: f32[8,1], index: 2, kind: input, shape index: {}]   ;;  %s821_s3 = inlined_call_operand.hbm [shape: f32[2,8,256], index: 3, kind: output, shape index: {}]  }
   0x1   :  { %10 = vsyncpa [#allocation3 + $0x1], 0 }
   0x2   :  { %11 = vsyncpa [#allocation4], 0 }
   0x3   :  { %13 = vsyncpa [#allocation4 + $0x1], 0  ;;  %s638_s12 = smov 0   ;;  %s640_s13 = smov 0  }
   0x4   :  { %s642_s14 = smov 0   ;;  %s644_s15 = smov 0  }
   0x5   :  { %s646_s16 = smov 0   ;;  %s648_s17 = smov 0  }
   0x6 LB: > { %s401_s18 = sadd.s32 4294967295, %s611_s17   ;;  %s402_s19 = sadd.s32 4294967294, %s611_s17   ;;  %s611_s17 = sphi %s648_s17, %s19_s17   ;;  %s607_s16 = sphi %s646_s16, %s836_s16   ;;  %s603_s15 = sphi %s644_s15, %s835_s15   ;;  %s599_s14 = sphi %s642_s14, %s834_s14   ;;  %s595_s13 = sphi %s640_s13, %s833_s13   ;;  %s591_s12 = sphi %s638_s12, %s832_s12  }
   0x7   : > { %s31_s20 = sadd.s32 1, %s607_s16  ;;  %s61_s21 = sadd.s32 1, %s599_s14 }
   0x8   : > { %p33_p0 = scmp.ge.s32.totalorder %s31_s20, 2  ;;  %p68_p1 = scmp.ne.s32.totalorder %s599_s14, %s595_s13 }
   0x9   : > { %p69_p2 = scmp.eq.s32.totalorder %s611_s17, 0  ;;  %p74_p3 = scmp.ne.s32.totalorder %s595_s13, %s591_s12 }
   0xa   : > { %s838_s20 = smov (%p33_p0, %s31_s20), 0  ;;  %p75_p5 = scmp.eq.s32.totalorder %s401_s18, 0 }
   0xb   : > { %p679_p4 = por %p69_p2, %p68_p1  ;;  %s56_s23 = ssub.s32 %s607_s16, %s838_s20 }
   0xc   : > { %p121_p6 = scmp.eq.s32.totalorder %s401_s18, 1  ;;  %p59_p7 = scmp.eq.s32.totalorder %s56_s23, 0 }
   0xd   : > { %p685_p8 = por %p75_p5, %p74_p3  ;;  %p127_p10 = scmp.eq.s32.totalorder %s402_s19, 1 }
   0xe   : > { %p689_p9 = por %p121_p6, %p68_p1  ;;  %p436_p13 = scmp.lt.s32.totalorder %s611_s17, 2 }
   0xf   : > { %s694_s26 = scalar_select %p59_p7, %s599_s14, %s61_s21  }
  0x10   : > { %s825_s25 = scalar_select %p689_p9, 1, 0 }
  0x11   : > { %p696_p11 = por %p127_p10, %p74_p3  ;;  %s153_s28 = sand.u32 1, %s599_s14  }
  0x12   : > { %s421_s29 = smul.u32 48, %s153_s28  ;;  %p706_p0 = pnand %p436_p13, %p679_p4 }
  0x13   : > { %s826_s27 = scalar_select %p696_p11, 1, 0 }
  0x14   : > { %s422_s30 = smul.u32 768, %s607_s16  ;;  %s157_s8 = scalar_lea.vmem [#allocation2], %s421_s29 }
  0x15   : > { %s166_s9 = sshll.u32 %s157_s8, 4  ;;  %s718_s10 = scalar_lea.sflag [#allocation3], %s153_s28  ;;  %s715_s9 = int_to_ptr.vmem [resolvable:$true] %s166_s9 }
  0x16   : > { %s713_s7 = scalar_lea.hbm %s819_s1, %s422_s30  ;;  %p501_p3 = pneg %p706_p0 }
  0x17   : > { %s499_s11 = scalar_lea.hbm %s713_s7, 768  ;;  %s504_s21 = scalar_lea.hbm %s819_s1, 1536 }
  0x18   : > { %p500_p2 = scmp.ne.s32.totalorder %s713_s7, %s499_s11  ;;  %p505_p6 = scmp.lt.u32.totalorder %s713_s7, %s819_s1 }
  0x19   : > { %p506_p7 = scmp.lt.u32.totalorder %s504_s21, %s499_s11  ;;  %p508_p13 = scmp.lt.u32.totalorder %s499_s11, %s713_s7 }
  0x1a   : > { %p502_p4 = pnand %p501_p3, %p500_p2 }
  0x1b   : > { %p507_p10 = por %p506_p7, %p505_p6 }
  0x1c   : > { %p503_p5 = pneg %p502_p4 }
  0x1d   : > { %p509_p12 = por %p508_p13, %p507_p10 }
  0x1f   : > { %p510_p1 = pnand %p509_p12, %p503_p5 }
  0x21   : > { %513 = shalt.err (!%p510_p1)
}
  0x22   : > { %s514_s28 = scalar_lea.vmem %s715_s9, 768  ;;  %s613_s29 = smov [#allocation2]  }
  0x23   : > { %p515_p2 = scmp.ne.s32.totalorder %s715_s9, %s514_s28  ;;  %s519_s30 = sshll.u32 %s613_s29, 4  ;;  %s520_s30 = int_to_ptr.vmem [resolvable:$false] %s519_s30 }
  0x24   : > { %s521_s5 = scalar_lea.vmem %s520_s30, 1536  ;;  %p522_p9 = scmp.lt.s32.totalorder %s715_s9, %s520_s30 }
  0x25   : > { %p517_p4 = pnand %p515_p2, %p501_p3  ;;  %p523_p6 = scmp.lt.s32.totalorder %s521_s5, %s514_s28 }
  0x27   : > { %p518_p11 = pneg %p517_p4  ;;  %p524_p7 = por %p523_p6, %p522_p9 }
  0x29   : > { %p525_p10 = pnand %p524_p7, %p518_p11 }
  0x2b   : > { %528 = shalt.err (!%p525_p10)
}
  0x2c   : > { %s614_s6 = smov 128   ;;  %s615_s8 = smov 8  }
  0x2d   : > { %431 = dma.hbm_to_vmem [thread:$0]  (!%p706_p0), %s713_s7, 768, %s715_s9, %s718_s10, %s614_s6, %s614_s6, %s615_s8  }
  0x2e   : > { %p174_p12 = scmp.lt.s32.totalorder %s611_s17, 3  ;;  %p828_p1 = scmp.ge.s32.totalorder %s611_s17, 1 }
  0x30   : > { %p175_p3 = pnand %p828_p1, %p174_p12 }
  0x31   : > { %s750_s11 = sand.u32 (!%p175_p3), 1, %s595_s13  }
  0x32   : > { %178 = sbr.rel (%p175_p3) target bundleno = 301 (0x12d), region = 32  ;;  %s181_s19 = scalar_lea.sflag (!%p175_p3), [#allocation3], %s750_s11 }
  0x33   : > { %s423_s18 = smul.u32 (!%p175_p3), 48, %s750_s11 }
  0x35   : > { %s184_s21 = scalar_lea.vmem (!%p175_p3), [#allocation2], %s423_s18 }
  0x39   : > { %582 = dma.done.wait (%p685_p8), %s181_s19, 768  }
  0x3a   : > { %584 = vsyncadd (%p685_p8), %s181_s19, 4294966528  ;;  %v616_v0 = vmov 0   ;;  %v490_v1 = vld [vmem:[%s184_s21 + $0x4] ss:$8 sps:$4 sm:$0xff]   ;;  %v492_v2 = vld [vmem:[%s184_s21] ss:$8 sps:$4 sm:$0xff]  }
  0x3b   : > { %289 = vmatprep.mubr.bf16.mxu0 %v616_v0  ;;  %489 = vset.pattern.permute.xlu0 %v616_v0  ;;  %v493_v3 = vld [vmem:[%s184_s21 + $0x14] ss:$8 sps:$4 sm:$0xff]   ;;  %v495_v4 = vld [vmem:[%s184_s21 + $0x10] ss:$8 sps:$4 sm:$0xff]   ;;  %v496_v5 = vld [vmem:[%s184_s21 + $0x24] ss:$8 sps:$4 sm:$0xff]  }
  0x3c   : > { %257 = vmatprep.subr.bf16.mxu0 %v490_v1  ;;  %v217_v6 = vld [vmem:[%s820_s2] sm:$0xff]  ;;  %vm253_vm0 = vcmask 392192   ;;  %s407_s10 = sshll.u32 %s750_s11, 4  ;;  %s420_s22 = sshll.u32 %s603_s15, 8 }
  0x3d   : > { %258 = vmatpush1.bf16.msra.mxu0 %v492_v2  ;;  %220 = vperm.xlu0 %489, %v217_v6   ;;  %v498_v7 = vld [vmem:[%s184_s21 + $0x20] ss:$8 sps:$4 sm:$0xff]   ;;  %s206_s23 = scalar_lea.vmem [#allocation5], %s407_s10  ;;  %s769_s5 = scalar_lea.hbm %s821_s3, %s420_s22 }
  0x3e   : > { %259 = vmatprep.subr.bf16.mxu0 %v493_v3  ;;  %v210_v8 = vld [vmem:[%s818_s0] sm:$0xf]  ;;  %s317_s28 = sshll.u32 %s206_s23, 4  ;;  %s301_s15 = scalar_lea.sflag [#allocation4], %s750_s11  ;;  %s771_s28 = int_to_ptr.vmem [resolvable:$true] %s317_s28 }
  0x3f   : > { %s529_s6 = scalar_lea.vmem %s771_s28, 256  ;;  %p829_p9 = scmp.ne.s32.totalorder %s825_s25, 0 }
  0x40   : > { %p530_p8 = scmp.ne.s32.totalorder %s771_s28, %s529_s6  ;;  %s617_s8 = smov [#allocation5]  }
  0x41   : > { %260 = vmatpush1.bf16.msra.mxu0 %v495_v4  ;;  %s533_s18 = sshll.u32 %s617_s8, 4  ;;  %s534_s18 = int_to_ptr.vmem [resolvable:$false] %s533_s18 }
  0x42   : > { %261 = vmatprep.subr.bf16.mxu0 %v496_v5  ;;  %p531_p11 = pnand %p530_p8, %p829_p9  ;;  %s535_s19 = scalar_lea.vmem %s534_s18, 512 }
  0x43   : > { %p536_p5 = scmp.lt.s32.totalorder %s771_s28, %s534_s18  ;;  %p537_p13 = scmp.lt.s32.totalorder %s535_s19, %s529_s6 }
  0x44   : > { %p532_p0 = pneg %p531_p11 }
  0x45   : > { %262 = vmatpush1.bf16.msra.mxu0 %v498_v7  ;;  %p538_p2 = por %p537_p13, %p536_p5 }
  0x47   : > { %p539_p4 = pnand %p538_p2, %p532_p0 }
  0x48   : > { %414 = vmatmul.mubr.msk.bf16.vlgmr.msra.gmra.mrb[0].mxu0 %vm253_vm0, %v210_v8 }
  0xbc   : > { %v221_v9 = vpop.permute.xlu0 %220 }
 0x11b   : > { %v291_v10 = vpop.f32.mrb[0].mxu0 }
 0x11c   : > { %v292_v11 = vadd.f32 %v291_v10, %v221_v9  ;;  %v293_v12 = vpop.f32.mrb[1].mxu0 }
 0x11d   : > { %v294_v13 = vadd.f32 %v293_v12, %v221_v9  ;;  %v295_v14 = vpop.f32.mrb[2].mxu0 }
 0x11e   : > { %298 = vst [vmem:[%s206_s23] sm:$0xff] %v292_v11  ;;  %v296_v15 = vpop.f32.mrb[3].mxu0 }
 0x11f   : > { %299 = vst [vmem:[%s206_s23 + $0x8] sm:$0xff] %v294_v13 }
 0x120   : > { %542 = shalt.err (!%p539_p4)
}
 0x121   : > { %s543_s11 = scalar_lea.hbm %s769_s5, 256  ;;  %s547_s7 = scalar_lea.hbm %s821_s3, 512 }
 0x122   : > { %p544_p6 = scmp.ne.s32.totalorder %s769_s5, %s543_s11  ;;  %p548_p12 = scmp.lt.u32.totalorder %s769_s5, %s821_s3 }
 0x123   : > { %p549_p1 = scmp.lt.u32.totalorder %s547_s7, %s543_s11  ;;  %p551_p8 = scmp.lt.u32.totalorder %s543_s11, %s769_s5 }
 0x124   : > { %p545_p7 = pnand %p544_p6, %p829_p9 }
 0x125   : > { %p550_p3 = por %p549_p1, %p548_p12 }
 0x126   : > { %p546_p10 = pneg %p545_p7 }
 0x127   : > { %p552_p11 = por %p551_p8, %p550_p3 }
 0x129   : > { %p553_p0 = pnand %p552_p11, %p546_p10 }
 0x12b   : > { %556 = shalt.err (!%p553_p0)
}
 0x12c   : > { %426 = dma.vmem_to_hbm [thread:$0]  (%p829_p9), %s771_s28, 256, %s769_s5, %s301_s15  }
 0x12d PF: > { %s329_s10 = sand.u32 1, %s591_s12   ;;  %p830_p5 = scmp.ne.s32.totalorder %s826_s27, 0 }
 0x12e   : > { %p831_p13 = scmp.ge.s32.totalorder %s611_s17, 2  ;;  %s330_s22 = scalar_lea.sflag [#allocation4], %s329_s10 }
 0x130   : > { %p433_p2 = pnand %p831_p13, %p830_p5 }
 0x132   : > { %586 = dma.done.wait (!%p433_p2), %s330_s22, 256  }
 0x133   : > { %588 = vsyncadd (!%p433_p2), %s330_s22, 4294967040  ;;  %s19_s17 = sadd.s32 1, %s611_s17   ;;  %s832_s12 = smov %s595_s13 }
 0x134   : > { %p16_p4 = scmp.ge.s32.totalorder %s19_s17, 4   ;;  %s833_s13 = smov %s599_s14 }
 0x135   : > { %s834_s14 = smov %s694_s26  ;;  %s835_s15 = smov %s607_s16 }
 0x136   : > { %s836_s16 = smov %s838_s20  ;;  %18 = sbr.rel (!%p16_p4) target bundleno = 6 (0x6), region = 77 }
 0x13d   :  { %335 = vsyncpa [#allocation3], 1 }
 0x13e   :  { %337 = vsyncpa [#allocation3 + $0x1], 1 }
 0x13f   :  { %338 = vsyncpa [#allocation4], 1 }
 0x140   :  { %340 = vsyncpa [#allocation4 + $0x1], 1 }

</bundles_post_ra>
